<compile_context>
chip_gen: v6e
topology: v6e:2x2x1
jax: 0.10.0
libtpu: 0.0.40
codegen_flags: <defaults>
</compile_context>

<pallas_src>
import jax
import jax.numpy as jnp
import numpy as np
from jax.experimental import pallas as pl
from jax.experimental.pallas import tpu as pltpu


def _diff_patch_kernel(x_ref, pool_ref, out_ref):
    # x_ref   : (T, H*W)      one channel of one clip, native storage dtype
    # pool_ref: (H*W, md*md)  one-hot block-pooling matrix, pre-scaled by 1/(T-1)
    # out_ref : (1, md*md)    per-batch patch scores, accumulated over the C axis
    c = pl.program_id(1)

    @pl.when(c == 0)
    def _():
        out_ref[...] = jnp.zeros_like(out_ref)

    t = x_ref.shape[0]
    # Temporal abs-diff via two overlapping sublane windows (frames 0..T-2 vs 1..T-1),
    # cast to f32 per chunk; never materializes a (C, T-1, H, W) tensor.
    a = x_ref[pl.ds(0, t - 1), :].astype(jnp.float32)
    b = x_ref[pl.ds(1, t - 1), :].astype(jnp.float32)
    diff_sum = jnp.sum(jnp.abs(a - b), axis=0, keepdims=True)          # (1, H*W)

    # Single fused block-sum pooling matmul (1/(T-1) mean already folded into pool).
    out_ref[...] += jnp.dot(diff_sum, pool_ref[...],
                            preferred_element_type=jnp.float32)       # (1, md*md)


def gen_static_diff_mask(x, mask_dim=7, motion_patch_ratio=0.5):
    """Equivalent of Gen_Static_Diff(mask_dim, motion_patch_ratio)(x, option='mask')."""
    B, C, T, H, W = x.shape
    assert H == W and H % mask_dim == 0, "The W, H of the video must be a multiple of mask_dim"
    bh = H // mask_dim
    bw = W // mask_dim

    # Fused one-hot pooling matrix (H*W, md*md) with the temporal mean folded in.
    pix_block = (jnp.arange(H)[:, None] // bh) * mask_dim + (jnp.arange(W)[None, :] // bw)
    pix_block = pix_block.reshape(H * W)
    pool = (pix_block[:, None] == jnp.arange(mask_dim * mask_dim)[None, :])
    pool = pool.astype(jnp.float32) * (1.0 / (T - 1))

    # Free contiguous view: spatial plane flattened onto the lane axis.
    x_flat = x.reshape(B, C, T, H * W)

    patch_sum = pl.pallas_call(
        _diff_patch_kernel,
        out_shape=jax.ShapeDtypeStruct((B, 1, mask_dim * mask_dim), jnp.float32),
        grid=(B, C),
        in_specs=[
            # Native dtype, one (T, H*W) channel per grid step; B/C dims squeezed.
            pl.BlockSpec((pl.Squeezed(), pl.Squeezed(), T, H * W),
                         lambda b, c: (b, c, 0, 0)),
            # Pooling matrix, resident across the whole grid.
            pl.BlockSpec((H * W, mask_dim * mask_dim), lambda b, c: (0, 0)),
        ],
        out_specs=pl.BlockSpec((pl.Squeezed(), 1, mask_dim * mask_dim),
                               lambda b, c: (b, 0, 0)),
        compiler_params=pltpu.CompilerParams(
            dimension_semantics=("parallel", "arbitrary")),
    )(x_flat, pool)

    # Tiny top-k + scatter into the binary mask (49 scores per batch) — plain-JAX glue.
    num_ma = int(motion_patch_ratio * mask_dim * mask_dim)
    flat = patch_sum.reshape(B, mask_dim * mask_dim)
    _, idx = jax.lax.top_k(flat, num_ma)
    mask = jnp.zeros_like(flat)
    mask = mask.at[jnp.arange(B)[:, None], idx].set(1.0)
    return mask.reshape(B, mask_dim, mask_dim)


def _reference_mask(x, mask_dim=7, motion_patch_ratio=0.5):
    """Pure-numpy re-implementation of diff_mask for a correctness check."""
    x = np.asarray(x, dtype=np.float32)
    B, C, T, H, W = x.shape
    diff_sum = np.abs(x[:, :, :-1] - x[:, :, 1:]).sum(axis=1).mean(axis=1)  # (B, H, W)
    patch = diff_sum.reshape(B, H, mask_dim, -1).sum(-1)
    patch = patch.reshape(B, mask_dim, -1, mask_dim).sum(-2)                # (B, md, md)
    num_ma = int(motion_patch_ratio * mask_dim * mask_dim)
    flat = patch.reshape(B, -1)
    idx = np.argsort(-flat, axis=-1, kind="stable")[:, :num_ma]
    mask = np.zeros_like(flat)
    for b in range(B):
        mask[b, idx[b]] = 1.0
    return mask.reshape(B, mask_dim, mask_dim)


if __name__ == "__main__":
    key = jax.random.PRNGKey(0)
    # Small clip: batch=2, channels=4, frames=8, spatial 14x14 (multiple of mask_dim=7).
    B, C, T, H, W = 2, 4, 8, 14, 14
    x = jax.random.uniform(key, (B, C, T, H, W), dtype=jnp.float32)

    out = gen_static_diff_mask(x, mask_dim=7, motion_patch_ratio=0.5)
    out = jax.block_until_ready(out)

    ref = _reference_mask(np.asarray(x), mask_dim=7, motion_patch_ratio=0.5)
    np.testing.assert_allclose(np.asarray(out), ref, atol=1e-5)
    print("KERNEL_OK")
</pallas_src>

<mosaic_0001>
module attributes {stable_mosaic.version = 11 : i64} {
  func.func @_diff_patch_kernel(%arg0: i32, %arg1: i32, %arg2: memref<1x1x8x196xf32, #tpu.memory_space<vmem>>, %arg3: memref<196x49xf32, #tpu.memory_space<vmem>>, %arg4: memref<1x1x49xf32, #tpu.memory_space<vmem>>) attributes {dimension_semantics = [#tpu.dimension_semantics<parallel>, #tpu.dimension_semantics<arbitrary>], iteration_bounds = array<i64: 2, 4>, scalar_prefetch = 0 : i64, scratch_operands = 0 : i64, tpu.core_type = #tpu.core_type<tc>, window_params = [{transform_indices = @transform_0, window_bounds = array<i64: 1, 1, 8, 196>}, {pipeline_mode = #tpu.pipeline_mode<synchronous>, transform_indices = @transform_1, window_bounds = array<i64: 196, 49>}, {transform_indices = @transform_2, window_bounds = array<i64: 1, 1, 49>}]} {
    %c0_i32 = arith.constant 0 : i32
    %0 = arith.cmpi eq, %arg1, %c0_i32 : i32
    %1 = arith.extui %0 : i1 to i32
    %c0_i32_0 = arith.constant 0 : i32
    %2 = arith.cmpi ne, %1, %c0_i32_0 : i32
    scf.if %2 {
      %cst_16 = arith.constant 0.000000e+00 : f32
      %19 = vector.broadcast %cst_16 : f32 to vector<1x49xf32>
      %c0_17 = arith.constant 0 : index
      %c0_18 = arith.constant 0 : index
      %c0_19 = arith.constant 0 : index
      %20 = vector.load %arg4[%c0_17, %c0_18, %c0_19] : memref<1x1x49xf32, #tpu.memory_space<vmem>>, vector<1x1x49xf32>
      %21 = vector.shape_cast %20 : vector<1x1x49xf32> to vector<1x49xf32>
      %22 = vector.shape_cast %19 : vector<1x49xf32> to vector<1x1x49xf32>
      tpu.vector_store %arg4[%c0_17, %c0_18, %c0_19], %22 {strides = array<i32>} : memref<1x1x49xf32, #tpu.memory_space<vmem>>, vector<1x1x49xf32>,
    } else {
    }
    %c0 = arith.constant 0 : index
    %c0_1 = arith.constant 0 : index
    %c0_2 = arith.constant 0 : index
    %c0_3 = arith.constant 0 : index
    %3 = vector.load %arg2[%c0, %c0_1, %c0_2, %c0_3] : memref<1x1x8x196xf32, #tpu.memory_space<vmem>>, vector<1x1x7x196xf32>
    %4 = vector.shape_cast %3 : vector<1x1x7x196xf32> to vector<7x196xf32>
    %c0_4 = arith.constant 0 : index
    %c0_5 = arith.constant 0 : index
    %c1 = arith.constant 1 : index
    %c0_6 = arith.constant 0 : index
    %5 = vector.load %arg2[%c0_4, %c0_5, %c1, %c0_6] : memref<1x1x8x196xf32, #tpu.memory_space<vmem>>, vector<1x1x7x196xf32>
    %6 = vector.shape_cast %5 : vector<1x1x7x196xf32> to vector<7x196xf32>
    %7 = arith.subf %4, %6 : vector<7x196xf32>
    %8 = math.absf %7 : vector<7x196xf32>
    %cst = arith.constant dense<0.000000e+00> : vector<196xf32>
    %9 = vector.multi_reduction <add>, %8, %cst [0] : vector<7x196xf32> to vector<196xf32>
    %10 = vector.shape_cast %9 : vector<196xf32> to vector<1x196xf32>
    %c0_7 = arith.constant 0 : index
    %c0_8 = arith.constant 0 : index
    %c0_9 = arith.constant 0 : index
    %11 = vector.load %arg4[%c0_7, %c0_8, %c0_9] : memref<1x1x49xf32, #tpu.memory_space<vmem>>, vector<1x1x49xf32>
    %12 = vector.shape_cast %11 : vector<1x1x49xf32> to vector<1x49xf32>
    %c0_10 = arith.constant 0 : index
    %c0_11 = arith.constant 0 : index
    %13 = vector.load %arg3[%c0_10, %c0_11] : memref<196x49xf32, #tpu.memory_space<vmem>>, vector<196x49xf32>
    %cst_12 = arith.constant dense<0.000000e+00> : vector<1x49xf32>
    %14 = tpu.matmul %10, %13, %cst_12 {dimension_numbers = #tpu.dot_dimension_numbers<[1], [0], [0], [1], [0, 0, 1, 1], [], []>} : vector<1x196xf32>, vector<196x49xf32>, vector<1x49xf32> -> vector<1x49xf32>
    %15 = arith.addf %12, %14 : vector<1x49xf32>
    %c0_13 = arith.constant 0 : index
    %c0_14 = arith.constant 0 : index
    %c0_15 = arith.constant 0 : index
    %16 = vector.load %arg4[%c0_13, %c0_14, %c0_15] : memref<1x1x49xf32, #tpu.memory_space<vmem>>, vector<1x1x49xf32>
    %17 = vector.shape_cast %16 : vector<1x1x49xf32> to vector<1x49xf32>
    %18 = vector.shape_cast %15 : vector<1x49xf32> to vector<1x1x49xf32>
    tpu.vector_store %arg4[%c0_13, %c0_14, %c0_15], %18 {strides = array<i32>} : memref<1x1x49xf32, #tpu.memory_space<vmem>>, vector<1x1x49xf32>,
    return
  }
  func.func @transform_0(%arg0: i32, %arg1: i32) -> (i32, i32, i32, i32) {
    %c0_i32 = arith.constant 0 : i32
    %c0_i32_0 = arith.constant 0 : i32
    %c0_i32_1 = arith.constant 0 : i32
    return %arg0, %arg1, %c0_i32, %c0_i32_0 : i32, i32, i32, i32
  }
  func.func @transform_1(%arg0: i32, %arg1: i32) -> (i32, i32) {
    %c0_i32 = arith.constant 0 : i32
    %c0_i32_0 = arith.constant 0 : i32
    %c0_i32_1 = arith.constant 0 : i32
    return %c0_i32, %c0_i32_0 : i32, i32
  }
  func.func @transform_2(%arg0: i32, %arg1: i32) -> (i32, i32, i32) {
    %c0_i32 = arith.constant 0 : i32
    %c0_i32_0 = arith.constant 0 : i32
    %c0_i32_1 = arith.constant 0 : i32
    return %arg0, %c0_i32, %c0_i32_0 : i32, i32, i32
  }
}

</mosaic_0001>

<bundles_post_ra>
// kernel: tpu_custom_call.1
= control target key start
LH: loop header
LB: loop body
LE: loop exit
PB: predicated region body
PF: predicated region fallthrough
CT: control target
= control target key end

     0   :  { %7 = vsyncpa [#allocation3], 0  ;;  %s841_s0 = inlined_call_operand.vmem [shape: f32[2,4,8,196], index: 0, kind: input, shape index: {}]   ;;  %s842_s1 = inlined_call_operand.vmem [shape: f32[196,49], index: 1, kind: input, shape index: {}]   ;;  %s843_s2 = inlined_call_operand.hbm [shape: f32[2,1,49], index: 2, kind: output, shape index: {}]  }
   0x1   :  { %9 = vsyncpa [#allocation3 + $0x1], 0  ;;  %s597_s9 = smov 0   ;;  %s599_s10 = smov 0  }
   0x2   :  { %s601_s11 = smov 0   ;;  %s603_s12 = smov 0  }
   0x3   :  { %s605_s13 = smov 0   ;;  %s607_s14 = smov 0  }
   0x4   :  { %s609_s15 = smov 0   ;;  %s611_s16 = smov 0  }
   0x5 LB: > { %s398_s17 = sadd.s32 4294967295, %s577_s16   ;;  %s399_s18 = sadd.s32 4294967294, %s577_s16   ;;  %s577_s16 = sphi %s611_s16, %s15_s16   ;;  %s573_s15 = sphi %s609_s15, %s852_s15   ;;  %s569_s14 = sphi %s607_s14, %s851_s14   ;;  %s565_s13 = sphi %s605_s13, %s850_s13   ;;  %s561_s12 = sphi %s603_s12, %s849_s12   ;;  %s557_s11 = sphi %s601_s11, %s848_s11   ;;  %s553_s10 = sphi %s599_s10, %s847_s10   ;;  %s549_s9 = sphi %s597_s9, %s846_s9  }
   0x6   : > { %s24_s19 = sadd.s32 1, %s569_s14  ;;  %s27_s20 = sadd.s32 1, %s573_s15 }
   0x7   : > { %p25_p0 = scmp.ge.s32.totalorder %s24_s19, 4  ;;  %p93_p1 = scmp.ne.s32.totalorder %s557_s11, %s553_s10 }
   0x8   : > { %p94_p2 = scmp.eq.s32.totalorder %s398_s17, 7  ;;  %p99_p4 = scmp.ne.s32.totalorder %s553_s10, %s549_s9 }
   0x9   : > { %s854_s19 = smov (%p25_p0, %s24_s19), 0  ;;  %s856_s20 = smov (!%p25_p0, %s27_s20), %s573_s15 }
   0xa   : > { %p646_p3 = por %p94_p2, %p93_p1  ;;  %p29_p5 = scmp.ge.s32.totalorder %s856_s20, 2 }
   0xb   : > { %p100_p6 = scmp.eq.s32.totalorder %s399_s18, 7  ;;  %p402_p7 = scmp.ge.s32.totalorder %s577_s16, 1 }
   0xc   : > { %p133_p8 = scmp.lt.s32.totalorder %s577_s16, 9  ;;  %s858_s20 = smov (%p29_p5, %s856_s20), 0 }
   0xd   : > { %p656_p9 = por %p100_p6, %p99_p4  ;;  %s80_s23 = ssub.s32 %s573_s15, %s858_s20 }
   0xe   : > { %p134_p10 = pnand %p402_p7, %p133_p8  ;;  %s83_s24 = sadd.s32 1, %s557_s11 }
   0xf   : > { %p81_p11 = scmp.eq.s32.totalorder %s80_s23, 0  ;;  %s156_s26 = sand.u32 (!%p134_p10), 1, %s553_s10  }
  0x10   : > { %137 = sbr.rel (%p134_p10) target bundleno = 289 (0x121), region = 28  ;;  %p158_p12 = scmp.lt.s32.totalorder (!%p134_p10), %s565_s13, 1 }
  0x11   : > { %s664_s25 = scalar_select %p81_p11, %s557_s11, %s83_s24  }
  0x12   : > { %p160_p13 = scmp.lt.s32.totalorder (!%p134_p10), %s561_s12, 3  ;;  %s678_s8 = scalar_lea.vmem (!%p134_p10), [#allocation2], %s156_s26 }
  0x13   : > { %p406_p0 = scmp.ne.s32.totalorder (!%p134_p10), %s561_s12, 0 }
  0x15   : > { %s159_s27 = scalar_select %p158_p12, %s565_s13, 1 }
  0x16   : > { %s161_s28 = scalar_select %p160_p13, %s561_s12, 3 }
  0x17   : > { %s404_s29 = sshll.u32 %s159_s27, 3  ;;  %170 = sbr.rel (%p406_p0) target bundleno = 30 (0x1e), region = 32 }
  0x18   : > { %s403_s30 = sshll.u32 %s161_s28, 1 }
  0x19   : > { %s164_s3 = sadd.s32 %s404_s29, %s403_s30 }
  0x1a   : > { %s405_s4 = sshll.u32 %s164_s3, 3 }
  0x1b   : > { %s674_s7 = scalar_lea.vmem %s841_s0, %s405_s4 }
  0x1c   : > { %vm171_vm0 = vcmask 393216   ;;  %v579_v0 = vmov 0.0  }
  0x1d   : > { %172 = vst.msk [vmem:[%s678_s8] sm:$0x1] %vm171_vm0, %v579_v0 }
  0x1e PF: > { %v219_v1 = vld [vmem:[%s842_s1 + $0x78] sm:$0xff]  ;;  %v580_v2 = vmov 0.0   ;;  %v218_v3 = vld [vmem:[%s842_s1 + $0x70] sm:$0xff]  ;;  %v217_v4 = vld [vmem:[%s842_s1 + $0x68] sm:$0xff]  ;;  %vm195_vm1 = vcmask 555008   ;;  %vm187_vm2 = vcmask 1046528  }
  0x1f   : > { %237 = vmatprep.subr.mxu0 %v580_v2  ;;  %v216_v5 = vld [vmem:[%s842_s1 + $0x60] sm:$0xff]  ;;  %v215_v6 = vld [vmem:[%s842_s1 + $0x58] sm:$0xff]  ;;  %v174_v7 = vld [vmem:[%s674_s7 + $0x8] sm:$0x7f]  ;;  %vm229_vm3 = vcmask 556032   ;;  %vm233_vm4 = vcmask 1043456  }
  0x20   : > { %238 = vmatpush1.msra.mxu0 %v219_v1  ;;  %v176_v8 = vld [vmem:[%s674_s7 + $0x8] sm:$0xfe]  ;;  %v214_v9 = vld [vmem:[%s842_s1 + $0x50] sm:$0xff]  ;;  %v175_v11 = vld [vmem:[%s674_s7] sm:$0xfe]  ;;  %s409_s30 = sshll.u32 %s565_s13, 4 }
  0x21   : > { %239 = vmatprep.subr.mxu0 %v580_v2  ;;  %v180_v10 = vrot.slane %v176_v8, 1  ;;  %v213_v12 = vld [vmem:[%s842_s1 + $0x48] sm:$0xff]  ;;  %v179_v14 = vrot.slane %v175_v11, 1  ;;  %v212_v15 = vld [vmem:[%s842_s1 + $0x40] sm:$0xff]  ;;  %v211_v18 = vld [vmem:[%s842_s1 + $0x38] sm:$0xff]  ;;  %s323_s3 = sshll.u32 %s678_s8, 4  ;;  %s792_s6 = scalar_lea.hbm %s843_s2, %s409_s30  ;;  %s324_s3 = int_to_ptr.vmem [resolvable:$true] %s323_s3 }
  0x22   : > { %240 = vmatpush1.msra.mxu0 %v218_v3  ;;  %v173_v17 = vld [vmem:[%s674_s7] sm:$0x7f]  ;;  %v210_v22 = vld [vmem:[%s842_s1 + $0x30] sm:$0xff]  ;;  %v209_v24 = vld [vmem:[%s842_s1 + $0x28] sm:$0xff]  ;;  %vm308_vm5 = vcmask 393216   ;;  %s311_s17 = scalar_lea.sflag [#allocation3], %s156_s26 }
  0x23   : > { %241 = vmatprep.subr.mxu0 %v580_v2  ;;  %v184_v13 = vsub.f32 %v174_v7, %v180_v10  ;;  %v183_v21 = vsub.f32 %v173_v17, %v179_v14  ;;  %v208_v27 = vld [vmem:[%s842_s1 + $0x20] sm:$0xff]  ;;  %v207_v29 = vld [vmem:[%s842_s1 + $0x18] sm:$0xff]  ;;  %v206_v32 = vld [vmem:[%s842_s1 + $0x10] sm:$0xff]  ;;  %s485_s18 = scalar_lea.vmem %s324_s3, 16  ;;  %s581_s13 = smov [#allocation2]  }
  0x24   : > { %242 = vmatpush1.msra.mxu0 %v217_v4  ;;  %v205_v34 = vld [vmem:[%s842_s1 + $0x8] sm:$0xff]  ;;  %v204_v36 = vld [vmem:[%s842_s1] sm:$0xff]  ;;  %v227_v39 = vld [vmem:[%s842_s1 + $0xb8] sm:$0xff]  ;;  %p486_p1 = scmp.ne.s32.totalorder %s324_s3, %s485_s18  ;;  %s489_s23 = sshll.u32 %s581_s13, 4  ;;  %s490_s23 = int_to_ptr.vmem [resolvable:$false] %s489_s23 }
  0x25   : > { %243 = vmatprep.subr.mxu0 %v580_v2  ;;  %v186_v16 = vand.u32 2147483647, %v184_v13  ;;  %v185_v26 = vand.u32 2147483647, %v183_v21  ;;  %v228_v37 = vld [vmem:[%s842_s1 + $0xc0] sm:$0xf]  ;;  %p492_p5 = scmp.lt.s32.totalorder %s324_s3, %s490_s23 }
  0x26   : > { %244 = vmatpush1.msra.mxu0 %v216_v5  ;;  %v226_v40 = vld [vmem:[%s842_s1 + $0xb0] sm:$0xff]  ;;  %v225_v42 = vld [vmem:[%s842_s1 + $0xa8] sm:$0xff]  ;;  %v224_v43 = vld [vmem:[%s842_s1 + $0xa0] sm:$0xff]  ;;  %p487_p2 = pnand %p486_p1, %p646_p3  ;;  %s491_s24 = scalar_lea.vmem %s490_s23, 32 }
  0x27   : > { %245 = vmatprep.subr.mxu0 %v580_v2  ;;  %v196_v19 = vsel %vm195_vm1, %v186_v16, 0.0  ;;  %v188_v31 = vsel %vm187_vm2, %v185_v26, 0.0  ;;  %v223_v45 = vld [vmem:[%s842_s1 + $0x98] sm:$0xff]  ;;  %v222_v46 = vld [vmem:[%s842_s1 + $0x90] sm:$0xff]  ;;  %v221_v48 = vld [vmem:[%s842_s1 + $0x88] sm:$0xff]  ;;  %p493_p6 = scmp.lt.s32.totalorder %s491_s24, %s485_s18 }
  0x28   : > { %246 = vmatpush1.msra.mxu0 %v215_v6  ;;  %v197_v20 = vrot.slane %v196_v19, 4  ;;  %v189_v35 = vrot.slane %v188_v31, 4  ;;  %v220_v49 = vld [vmem:[%s842_s1 + $0x80] sm:$0xff]  ;;  %p488_p4 = pneg %p487_p2 }
  0x29   : > { %247 = vmatprep.subr.mxu0 %v580_v2  ;;  %v203_v51 = vld [vmem:[%s678_s8] sm:$0x1]  ;;  %p494_p7 = por %p493_p6, %p492_p5 }
  0x2a   : > { %248 = vmatpush1.msra.mxu0 %v214_v9  ;;  %v198_v23 = vadd.f32 %v197_v20, %v196_v19  ;;  %v190_v38 = vadd.f32 %v189_v35, %v188_v31 }
  0x2b   : > { %249 = vmatprep.subr.mxu0 %v580_v2  ;;  %p495_p8 = pnand %p494_p7, %p488_p4 }
  0x2c   : > { %250 = vmatpush1.msra.mxu0 %v213_v12  ;;  %v199_v25 = vrot.slane %v198_v23, 2  ;;  %v191_v41 = vrot.slane %v190_v38, 2 }
  0x2d   : > { %251 = vmatprep.subr.mxu0 %v580_v2 }
  0x2e   : > { %252 = vmatpush1.msra.mxu0 %v212_v15  ;;  %v200_v28 = vadd.f32 %v199_v25, %v198_v23  ;;  %v192_v44 = vadd.f32 %v191_v41, %v190_v38 }
  0x2f   : > { %253 = vmatprep.subr.mxu0 %v580_v2 }
  0x30   : > { %254 = vmatpush1.msra.mxu0 %v211_v18  ;;  %v201_v30 = vrot.slane %v200_v28, 1  ;;  %v193_v47 = vrot.slane %v192_v44, 1 }
  0x31   : > { %255 = vmatprep.subr.mxu0 %v580_v2 }
  0x32   : > { %256 = vmatpush1.msra.mxu0 %v210_v22  ;;  %v202_v33 = vadd.f32 %v201_v30, %v200_v28  ;;  %v194_v50 = vadd.f32 %v193_v47, %v192_v44 }
  0x33   : > { %257 = vmatprep.subr.mxu0 %v580_v2 }
  0x34   : > { %258 = vmatpush1.msra.mxu0 %v209_v24  ;;  %408 = vmatprep.mubr.msk.f32.mxu0 %vm229_vm3, %v202_v33 }
  0x35   : > { %259 = vmatprep.subr.mxu0 %v580_v2 }
  0x36   : > { %260 = vmatpush1.msra.mxu0 %v208_v27 }
  0x37   : > { %261 = vmatprep.subr.mxu0 %v580_v2 }
  0x38   : > { %262 = vmatpush1.msra.mxu0 %v207_v29 }
  0x39   : > { %263 = vmatprep.subr.mxu0 %v580_v2 }
  0x3a   : > { %264 = vmatpush1.msra.mxu0 %v206_v32 }
  0x3b   : > { %265 = vmatprep.subr.mxu0 %v580_v2 }
  0x3c   : > { %266 = vmatpush1.msra.mxu0 %v205_v34 }
  0x3d   : > { %267 = vmatprep.subr.mxu0 %v580_v2 }
  0x3e   : > { %268 = vmatpush1.msra.mxu0 %v204_v36 }
  0x3f   : > { %283 = vmatprep.subr.mxu0 %v580_v2 }
  0x40   : > { %407 = vmatpush2.msk.msra.mxu0 %vm233_vm4, %v228_v37 }
  0x41   : > { %285 = vmatprep.subr.mxu0 %v580_v2 }
  0x42   : > { %286 = vmatpush2.msra.mxu0 %v227_v39 }
  0x43   : > { %287 = vmatprep.subr.mxu0 %v580_v2 }
  0x44   : > { %288 = vmatpush2.msra.mxu0 %v226_v40 }
  0x45   : > { %289 = vmatprep.subr.mxu0 %v580_v2 }
  0x46   : > { %290 = vmatpush2.msra.mxu0 %v225_v42 }
  0x47   : > { %291 = vmatprep.subr.mxu0 %v580_v2 }
  0x48   : > { %292 = vmatpush2.msra.mxu0 %v224_v43 }
  0x49   : > { %293 = vmatprep.subr.mxu0 %v580_v2 }
  0x4a   : > { %294 = vmatpush2.msra.mxu0 %v223_v45 }
  0x4b   : > { %295 = vmatprep.subr.mxu0 %v580_v2 }
  0x4c   : > { %296 = vmatpush2.msra.mxu0 %v222_v46 }
  0x4d   : > { %297 = vmatprep.subr.mxu0 %v580_v2 }
  0x4e   : > { %298 = vmatpush2.msra.mxu0 %v221_v48 }
  0x4f   : > { %299 = vmatprep.subr.mxu0 %v580_v2 }
  0x50   : > { %300 = vmatpush2.msra.mxu0 %v220_v49 }
  0x51   : > { %302 = vmatmul.mubr.f32.vlgmr.msra.gmra.mxu0 %v194_v50 }
 0x111   : > { %v303_v52 = vpop.f32.mrf.mxu0 }
 0x112   : > { %v307_v53 = vadd.f32 %v303_v52, %v203_v51 }
 0x113   : > { %v305_v54 = vpop.f32.mrf.mxu0 }
 0x114   : > { %309 = vst.msk [vmem:[%s678_s8] sm:$0x1] %vm308_vm5, %v307_v53 }
 0x115   : > { %498 = shalt.err (!%p495_p8)
}
 0x116   : > { %s499_s8 = scalar_lea.hbm %s792_s6, 16  ;;  %s503_s27 = scalar_lea.hbm %s843_s2, 32 }
 0x117   : > { %p500_p10 = scmp.ne.s32.totalorder %s792_s6, %s499_s8  ;;  %p504_p13 = scmp.lt.s32.totalorder %s792_s6, %s843_s2 }
 0x118   : > { %p505_p0 = scmp.lt.s32.totalorder %s503_s27, %s499_s8 }
 0x119   : > { %p501_p11 = pnand %p500_p10, %p646_p3 }
 0x11a   : > { %p506_p1 = por %p505_p0, %p504_p13 }
 0x11b   : > { %p502_p12 = pneg %p501_p11 }
 0x11d   : > { %p507_p2 = pnand %p506_p1, %p502_p12 }
 0x11f   : > { %510 = shalt.err (!%p507_p2)
}
 0x120   : > { %412 = dma.vmem_to_hbm [thread:$0]  (%p646_p3), %s324_s3, 16, %s792_s6, %s311_s17  }
 0x121 PF: > { %p418_p4 = scmp.ge.s32.totalorder %s577_s16, 2  ;;  %s335_s29 = sand.u32 1, %s549_s9  }
 0x122   : > { %s336_s30 = scalar_lea.sflag [#allocation3], %s335_s29 }
 0x123   : > { %p415_p5 = pnand %p418_p4, %p656_p9 }
 0x125   : > { %p416_p6 = pneg %p415_p5 }
 0x127   : > { %544 = dma.done.wait (%p416_p6), %s336_s30, 16  }
 0x128   : > { %546 = vsyncadd (%p416_p6), %s336_s30, 4294967280  ;;  %s15_s16 = sadd.s32 1, %s577_s16   ;;  %s846_s9 = smov %s553_s10 }
 0x129   : > { %p12_p7 = scmp.ge.s32.totalorder %s15_s16, 10   ;;  %s847_s10 = smov %s557_s11 }
 0x12a   : > { %s848_s11 = smov %s664_s25  ;;  %s849_s12 = smov %s569_s14 }
 0x12b   : > { %s850_s13 = smov %s573_s15  ;;  %s851_s14 = smov %s854_s19 }
 0x12c   : > { %s852_s15 = smov %s858_s20  ;;  %14 = sbr.rel (!%p12_p7) target bundleno = 5 (0x5), region = 67 }
 0x131   :  { %340 = vsyncpa [#allocation3], 1 }
 0x132   :  { %342 = vsyncpa [#allocation3 + $0x1], 1 }

</bundles_post_ra>
